<compile_context>
chip_gen: v7x
topology: tpu7x:2x2x1
jax: 0.10.0
libtpu: 0.0.40
codegen_flags: <defaults>
</compile_context>

<pallas_src>
import jax
import jax.numpy as jnp
from jax.experimental import pallas as pl
from jax.experimental.pallas import tpu as pltpu


# ----------------------------------------------------------------------------
# Fused Pallas kernel: whole TCN + last-step linear, one batch element per step
# ----------------------------------------------------------------------------
def _make_fused_tcn_kernel(blocks_cfg, kernel_size, last_col, l_pad):
    """blocks_cfg: tuple of (dilation, has_downsample) per TemporalBlock."""
    K = kernel_size
    win = l_pad - 128           # start of last 128-lane window (multiple of 128)
    col = last_col - win        # column of the last *valid* timestep in window

    def shift_right(x, s):
        # result[:, t] = x[:, t - s] for t >= s, else 0  (== causal left pad)
        if s == 0:
            return x
        rolled = pltpu.roll(x, shift=s, axis=1)                  # XLU rotate
        lane = jax.lax.broadcasted_iota(jnp.int32, x.shape, 1)
        return jnp.where(lane < s, 0.0, rolled)

    def causal_conv(x, w_stacked, dilation):
        # x: (C_in_pad, L_pad), w_stacked: (C_out_pad, K*C_in_pad)
        taps = [shift_right(x, (K - 1 - j) * dilation) for j in range(K)]
        stacked = taps[0] if K == 1 else jnp.concatenate(taps, axis=0)
        return jnp.dot(w_stacked, stacked, preferred_element_type=jnp.float32)

    def kernel(*refs):
        x_ref = refs[0]
        lin_w_ref, lin_b_ref, o_ref = refs[-3], refs[-2], refs[-1]
        w_refs = refs[1:-3]

        h = x_ref[0]                                             # (C0_pad, L_pad)
        wi = 0
        for dilation, has_down in blocks_cfg:
            w1 = w_refs[wi][...]
            w2 = w_refs[wi + 1][...]
            wi += 2
            if has_down:                                         # 1x1 downsample
                res = jnp.dot(w_refs[wi][...], h,
                              preferred_element_type=jnp.float32)
                wi += 1
            else:
                res = h
            h1 = jnp.maximum(causal_conv(h, w1, dilation), 0.0)   # conv1+chomp+relu
            h2 = jnp.maximum(causal_conv(h1, w2, dilation), 0.0)  # conv2+chomp+relu
            h = jnp.maximum(h2 + res, 0.0)                        # residual + relu

        # Fused last-timestep BBBLinear: MXU-native (O_pad, C_pad)x(C_pad, 128)
        # over the final lane window; keep only the valid column.
        logits = jnp.dot(lin_w_ref[...], h[:, win:win + 128],
                         preferred_element_type=jnp.float32)      # (O_pad, 128)
        o_ref[0] = logits[:, col:col + 1] + lin_b_ref[...]

    return kernel


# ----------------------------------------------------------------------------
# Glue (weight_norm, weight stacking/padding, KL scalar)
# ----------------------------------------------------------------------------
def _round_up(v, m):
    return -(-v // m) * m


def weight_norm_eff(v, g):
    # torch.nn.utils.weight_norm default dim=0: norm over all dims except 0
    norm = jnp.sqrt(jnp.sum(v * v, axis=(1, 2), keepdims=True))
    return g * v / norm


def _stack_conv_weight(w, cout_pad, cin_pad):
    """(C_out, C_in, K) -> (C_out_pad, K*C_in_pad) matching in-kernel tap stacking."""
    cout, cin, k = w.shape
    w_p = jnp.pad(w, ((0, cout_pad - cout), (0, cin_pad - cin), (0, 0)))
    return jnp.transpose(w_p, (0, 2, 1)).reshape(cout_pad, k * cin_pad)


def kl_of(log_alpha, weight_numel):
    return (weight_numel / log_alpha.size) * 0.5 * jnp.sum(
        jnp.log1p(jnp.exp(-log_alpha))
    )


def compute_kl(params):
    kl = jnp.float32(0.0)
    for blk in params["blocks"]:
        kl = kl + kl_of(blk["conv1_log_alpha"], blk["conv1_v"].size)
        kl = kl + kl_of(blk["conv2_log_alpha"], blk["conv2_v"].size)
        if blk["down_w"] is not None:
            kl = kl + kl_of(blk["down_log_alpha"], blk["down_w"].size)
    kl = kl + kl_of(params["lin_log_alpha"], params["lin_w"].size)
    return kl


def init_params(key, input_size, num_channels, kernel_size, output_size):
    keys = iter(jax.random.split(key, 64))
    nk = lambda: next(keys)
    blocks = []
    for i, cout in enumerate(num_channels):
        cin = input_size if i == 0 else num_channels[i - 1]
        blk = dict(
            dilation=2 ** i,
            conv1_v=0.3 * jax.random.normal(nk(), (cout, cin, kernel_size), jnp.float32),
            conv1_g=jax.random.uniform(nk(), (cout, 1, 1), jnp.float32, 0.5, 1.5),
            conv1_log_alpha=0.1 * jax.random.normal(nk(), (1, 1), jnp.float32) - 4.0,
            conv2_v=0.3 * jax.random.normal(nk(), (cout, cout, kernel_size), jnp.float32),
            conv2_g=jax.random.uniform(nk(), (cout, 1, 1), jnp.float32, 0.5, 1.5),
            conv2_log_alpha=0.1 * jax.random.normal(nk(), (1, 1), jnp.float32) - 4.0,
        )
        if cin != cout:
            blk["down_w"] = 0.3 * jax.random.normal(nk(), (cout, cin, 1), jnp.float32)
            blk["down_log_alpha"] = 0.1 * jax.random.normal(nk(), (1, 1), jnp.float32) - 4.0
        else:
            blk["down_w"] = None
            blk["down_log_alpha"] = None
        blocks.append(blk)
    c_last = num_channels[-1]
    return dict(
        blocks=blocks,
        lin_w=0.3 * jax.random.normal(nk(), (output_size, c_last), jnp.float32),
        lin_b=0.1 * jax.random.normal(nk(), (output_size,), jnp.float32),
        lin_log_alpha=0.1 * jax.random.normal(nk(), (1, 1), jnp.float32) - 4.0,
    )


# ----------------------------------------------------------------------------
# BBBTCN forward (single fused Pallas hot path)
# ----------------------------------------------------------------------------
def bbbtcn_forward(params, x):
    N, c_in, L = x.shape
    K = params["blocks"][0]["conv1_v"].shape[-1]
    l_pad = _round_up(L, 128)
    c0_pad = _round_up(c_in, 8)

    # One-time (8,128) alignment of the network input (trailing time zeros never
    # affect a valid causal output; padded channel rows stay zero everywhere).
    xp = jnp.pad(x, ((0, 0), (0, c0_pad - c_in), (0, l_pad - L)))

    weights, blocks_cfg = [], []
    cin = c_in
    for blk in params["blocks"]:
        w1 = weight_norm_eff(blk["conv1_v"], blk["conv1_g"])
        w2 = weight_norm_eff(blk["conv2_v"], blk["conv2_g"])
        cout = w1.shape[0]
        cin_p, cout_p = _round_up(cin, 8), _round_up(cout, 8)
        weights.append(_stack_conv_weight(w1, cout_p, cin_p))     # (Cout_p, K*Cin_p)
        weights.append(_stack_conv_weight(w2, cout_p, cout_p))    # (Cout_p, K*Cout_p)
        has_down = blk["down_w"] is not None
        if has_down:
            wd = blk["down_w"][:, :, 0]                           # (Cout, Cin)
            weights.append(jnp.pad(wd, ((0, cout_p - cout), (0, cin_p - cin))))
        blocks_cfg.append((blk["dilation"], has_down))
        cin = cout

    c_last_p = _round_up(cin, 8)
    out_size = params["lin_w"].shape[0]
    o_pad = _round_up(out_size, 8)
    lin_w_p = jnp.pad(params["lin_w"], ((0, o_pad - out_size), (0, c_last_p - cin)))
    lin_b_p = jnp.pad(params["lin_b"], (0, o_pad - out_size)).reshape(o_pad, 1)

    kernel = _make_fused_tcn_kernel(tuple(blocks_cfg), K, L - 1, l_pad)

    in_specs = [pl.BlockSpec((1, c0_pad, l_pad), lambda n: (n, 0, 0))]
    for w in weights + [lin_w_p, lin_b_p]:
        in_specs.append(pl.BlockSpec(w.shape, lambda n: (0, 0)))

    logits = pl.pallas_call(
        kernel,
        grid=(N,),
        in_specs=in_specs,
        out_specs=pl.BlockSpec((1, o_pad, 1), lambda n: (n, 0, 0)),
        out_shape=jax.ShapeDtypeStruct((N, o_pad, 1), jnp.float32),
        compiler_params=pltpu.CompilerParams(dimension_semantics=("parallel",)),
    )(xp, *weights, lin_w_p, lin_b_p)

    o = logits[:, :out_size, 0]
    kl = compute_kl(params)
    return o, kl


# ----------------------------------------------------------------------------
# Pure-JAX reference for correctness checking
# ----------------------------------------------------------------------------
def _ref_conv(x, w, dilation):
    K = w.shape[-1]
    pad = (K - 1) * dilation
    out = jax.lax.conv_general_dilated(
        x, w, window_strides=(1,), padding=[(pad, pad)],
        rhs_dilation=(dilation,), dimension_numbers=("NCH", "OIH", "NCH"),
    )
    return out[:, :, : x.shape[-1]]      # Chomp1d


def reference_forward(params, x):
    h = x
    for blk in params["blocks"]:
        d = blk["dilation"]
        w1 = weight_norm_eff(blk["conv1_v"], blk["conv1_g"])
        w2 = weight_norm_eff(blk["conv2_v"], blk["conv2_g"])
        h1 = jax.nn.relu(_ref_conv(h, w1, d))
        h2 = jax.nn.relu(_ref_conv(h1, w2, d))
        res = h if blk["down_w"] is None else _ref_conv(h, blk["down_w"], 1)
        h = jax.nn.relu(h2 + res)
    o = h[:, :, -1] @ params["lin_w"].T + params["lin_b"]
    return o, compute_kl(params)


# ----------------------------------------------------------------------------
if __name__ == "__main__":
    N, L = 2, 32
    input_size, output_size = 4, 10
    num_channels = (8, 8)
    kernel_size = 3

    params = init_params(jax.random.PRNGKey(0), input_size, num_channels,
                         kernel_size, output_size)
    x = jax.random.normal(jax.random.PRNGKey(1), (N, input_size, L), jnp.float32)

    o, kl = bbbtcn_forward(params, x)
    (o, kl) = jax.block_until_ready((o, kl))

    o_ref, kl_ref = reference_forward(params, x)
    assert o.shape == (N, output_size)
    assert jnp.allclose(o, o_ref, atol=2e-4, rtol=2e-4), "logits mismatch"
    assert jnp.allclose(kl, kl_ref, atol=1e-5, rtol=1e-5), "kl mismatch"

    print("KERNEL_OK")
</pallas_src>

<mosaic_0001>
module attributes {stable_mosaic.version = 11 : i64} {
  func.func @kernel(%arg0: i32, %arg1: memref<1x8x128xf32, #tpu.memory_space<vmem>>, %arg2: memref<8x24xf32, #tpu.memory_space<vmem>>, %arg3: memref<8x24xf32, #tpu.memory_space<vmem>>, %arg4: memref<8x8xf32, #tpu.memory_space<vmem>>, %arg5: memref<8x24xf32, #tpu.memory_space<vmem>>, %arg6: memref<8x24xf32, #tpu.memory_space<vmem>>, %arg7: memref<16x8xf32, #tpu.memory_space<vmem>>, %arg8: memref<16x1xf32, #tpu.memory_space<vmem>>, %arg9: memref<1x16x1xf32, #tpu.memory_space<vmem>>) attributes {dimension_semantics = [#tpu.dimension_semantics<parallel>], iteration_bounds = array<i64: 2>, scalar_prefetch = 0 : i64, scratch_operands = 0 : i64, tpu.core_type = #tpu.core_type<tc>, window_params = [{transform_indices = @transform_0, window_bounds = array<i64: 1, 8, 128>}, {pipeline_mode = #tpu.pipeline_mode<synchronous>, transform_indices = @transform_1, window_bounds = array<i64: 8, 24>}, {pipeline_mode = #tpu.pipeline_mode<synchronous>, transform_indices = @transform_2, window_bounds = array<i64: 8, 24>}, {pipeline_mode = #tpu.pipeline_mode<synchronous>, transform_indices = @transform_3, window_bounds = array<i64: 8, 8>}, {pipeline_mode = #tpu.pipeline_mode<synchronous>, transform_indices = @transform_4, window_bounds = array<i64: 8, 24>}, {pipeline_mode = #tpu.pipeline_mode<synchronous>, transform_indices = @transform_5, window_bounds = array<i64: 8, 24>}, {pipeline_mode = #tpu.pipeline_mode<synchronous>, transform_indices = @transform_6, window_bounds = array<i64: 16, 8>}, {pipeline_mode = #tpu.pipeline_mode<synchronous>, transform_indices = @transform_7, window_bounds = array<i64: 16, 1>}, {transform_indices = @transform_8, window_bounds = array<i64: 1, 16, 1>}]} {
    %c0 = arith.constant 0 : index
    %c0_0 = arith.constant 0 : index
    %c0_1 = arith.constant 0 : index
    %0 = vector.load %arg1[%c0, %c0_0, %c0_1] : memref<1x8x128xf32, #tpu.memory_space<vmem>>, vector<1x8x128xf32>
    %1 = vector.shape_cast %0 : vector<1x8x128xf32> to vector<8x128xf32>
    %c0_2 = arith.constant 0 : index
    %c0_3 = arith.constant 0 : index
    %2 = vector.load %arg2[%c0_2, %c0_3] : memref<8x24xf32, #tpu.memory_space<vmem>>, vector<8x24xf32>
    %c0_4 = arith.constant 0 : index
    %c0_5 = arith.constant 0 : index
    %3 = vector.load %arg3[%c0_4, %c0_5] : memref<8x24xf32, #tpu.memory_space<vmem>>, vector<8x24xf32>
    %c0_6 = arith.constant 0 : index
    %c0_7 = arith.constant 0 : index
    %4 = vector.load %arg4[%c0_6, %c0_7] : memref<8x8xf32, #tpu.memory_space<vmem>>, vector<8x8xf32>
    %cst = arith.constant dense<0.000000e+00> : vector<8x128xf32>
    %5 = tpu.matmul %4, %1, %cst {dimension_numbers = #tpu.dot_dimension_numbers<[1], [0], [0], [1], [0, 0, 1, 1], [], []>} : vector<8x8xf32>, vector<8x128xf32>, vector<8x128xf32> -> vector<8x128xf32>
    %c2_i32 = arith.constant 2 : i32
    %6 = tpu.dynamic_rotate %1 by %c2_i32 dim 1 : vector<8x128xf32>, i32 -> vector<8x128xf32>
    %7 = tpu.iota {dimensions = array<i32: 1>} : vector<8x128xi32>
    %c2_i32_8 = arith.constant 2 : i32
    %8 = vector.broadcast %c2_i32_8 : i32 to vector<8x128xi32>
    %9 = arith.cmpi slt, %7, %8 : vector<8x128xi32>
    %cst_9 = arith.constant 0.000000e+00 : f32
    %10 = vector.broadcast %cst_9 : f32 to vector<8x128xf32>
    %11 = arith.select %9, %10, %6 : vector<8x128xi1>, vector<8x128xf32>
    %c1_i32 = arith.constant 1 : i32
    %12 = tpu.dynamic_rotate %1 by %c1_i32 dim 1 : vector<8x128xf32>, i32 -> vector<8x128xf32>
    %13 = tpu.iota {dimensions = array<i32: 1>} : vector<8x128xi32>
    %c1_i32_10 = arith.constant 1 : i32
    %14 = vector.broadcast %c1_i32_10 : i32 to vector<8x128xi32>
    %15 = arith.cmpi slt, %13, %14 : vector<8x128xi32>
    %cst_11 = arith.constant 0.000000e+00 : f32
    %16 = vector.broadcast %cst_11 : f32 to vector<8x128xf32>
    %17 = arith.select %15, %16, %12 : vector<8x128xi1>, vector<8x128xf32>
    %18 = tpu.concatenate %11, %17, %1 in 0 : vector<8x128xf32>, vector<8x128xf32>, vector<8x128xf32> -> vector<24x128xf32>
    %cst_12 = arith.constant dense<0.000000e+00> : vector<8x128xf32>
    %19 = tpu.matmul %2, %18, %cst_12 {dimension_numbers = #tpu.dot_dimension_numbers<[1], [0], [0], [1], [0, 0, 1, 1], [], []>} : vector<8x24xf32>, vector<24x128xf32>, vector<8x128xf32> -> vector<8x128xf32>
    %cst_13 = arith.constant 0.000000e+00 : f32
    %20 = vector.broadcast %cst_13 : f32 to vector<8x128xf32>
    %21 = arith.maximumf %19, %20 : vector<8x128xf32>
    %c2_i32_14 = arith.constant 2 : i32
    %22 = tpu.dynamic_rotate %21 by %c2_i32_14 dim 1 : vector<8x128xf32>, i32 -> vector<8x128xf32>
    %23 = tpu.iota {dimensions = array<i32: 1>} : vector<8x128xi32>
    %c2_i32_15 = arith.constant 2 : i32
    %24 = vector.broadcast %c2_i32_15 : i32 to vector<8x128xi32>
    %25 = arith.cmpi slt, %23, %24 : vector<8x128xi32>
    %cst_16 = arith.constant 0.000000e+00 : f32
    %26 = vector.broadcast %cst_16 : f32 to vector<8x128xf32>
    %27 = arith.select %25, %26, %22 : vector<8x128xi1>, vector<8x128xf32>
    %c1_i32_17 = arith.constant 1 : i32
    %28 = tpu.dynamic_rotate %21 by %c1_i32_17 dim 1 : vector<8x128xf32>, i32 -> vector<8x128xf32>
    %29 = tpu.iota {dimensions = array<i32: 1>} : vector<8x128xi32>
    %c1_i32_18 = arith.constant 1 : i32
    %30 = vector.broadcast %c1_i32_18 : i32 to vector<8x128xi32>
    %31 = arith.cmpi slt, %29, %30 : vector<8x128xi32>
    %cst_19 = arith.constant 0.000000e+00 : f32
    %32 = vector.broadcast %cst_19 : f32 to vector<8x128xf32>
    %33 = arith.select %31, %32, %28 : vector<8x128xi1>, vector<8x128xf32>
    %34 = tpu.concatenate %27, %33, %21 in 0 : vector<8x128xf32>, vector<8x128xf32>, vector<8x128xf32> -> vector<24x128xf32>
    %cst_20 = arith.constant dense<0.000000e+00> : vector<8x128xf32>
    %35 = tpu.matmul %3, %34, %cst_20 {dimension_numbers = #tpu.dot_dimension_numbers<[1], [0], [0], [1], [0, 0, 1, 1], [], []>} : vector<8x24xf32>, vector<24x128xf32>, vector<8x128xf32> -> vector<8x128xf32>
    %cst_21 = arith.constant 0.000000e+00 : f32
    %36 = vector.broadcast %cst_21 : f32 to vector<8x128xf32>
    %37 = arith.maximumf %35, %36 : vector<8x128xf32>
    %38 = arith.addf %37, %5 : vector<8x128xf32>
    %cst_22 = arith.constant 0.000000e+00 : f32
    %39 = vector.broadcast %cst_22 : f32 to vector<8x128xf32>
    %40 = arith.maximumf %38, %39 : vector<8x128xf32>
    %c0_23 = arith.constant 0 : index
    %c0_24 = arith.constant 0 : index
    %41 = vector.load %arg5[%c0_23, %c0_24] : memref<8x24xf32, #tpu.memory_space<vmem>>, vector<8x24xf32>
    %c0_25 = arith.constant 0 : index
    %c0_26 = arith.constant 0 : index
    %42 = vector.load %arg6[%c0_25, %c0_26] : memref<8x24xf32, #tpu.memory_space<vmem>>, vector<8x24xf32>
    %c4_i32 = arith.constant 4 : i32
    %43 = tpu.dynamic_rotate %40 by %c4_i32 dim 1 : vector<8x128xf32>, i32 -> vector<8x128xf32>
    %44 = tpu.iota {dimensions = array<i32: 1>} : vector<8x128xi32>
    %c4_i32_27 = arith.constant 4 : i32
    %45 = vector.broadcast %c4_i32_27 : i32 to vector<8x128xi32>
    %46 = arith.cmpi slt, %44, %45 : vector<8x128xi32>
    %cst_28 = arith.constant 0.000000e+00 : f32
    %47 = vector.broadcast %cst_28 : f32 to vector<8x128xf32>
    %48 = arith.select %46, %47, %43 : vector<8x128xi1>, vector<8x128xf32>
    %c2_i32_29 = arith.constant 2 : i32
    %49 = tpu.dynamic_rotate %40 by %c2_i32_29 dim 1 : vector<8x128xf32>, i32 -> vector<8x128xf32>
    %50 = tpu.iota {dimensions = array<i32: 1>} : vector<8x128xi32>
    %c2_i32_30 = arith.constant 2 : i32
    %51 = vector.broadcast %c2_i32_30 : i32 to vector<8x128xi32>
    %52 = arith.cmpi slt, %50, %51 : vector<8x128xi32>
    %cst_31 = arith.constant 0.000000e+00 : f32
    %53 = vector.broadcast %cst_31 : f32 to vector<8x128xf32>
    %54 = arith.select %52, %53, %49 : vector<8x128xi1>, vector<8x128xf32>
    %55 = tpu.concatenate %48, %54, %40 in 0 : vector<8x128xf32>, vector<8x128xf32>, vector<8x128xf32> -> vector<24x128xf32>
    %cst_32 = arith.constant dense<0.000000e+00> : vector<8x128xf32>
    %56 = tpu.matmul %41, %55, %cst_32 {dimension_numbers = #tpu.dot_dimension_numbers<[1], [0], [0], [1], [0, 0, 1, 1], [], []>} : vector<8x24xf32>, vector<24x128xf32>, vector<8x128xf32> -> vector<8x128xf32>
    %cst_33 = arith.constant 0.000000e+00 : f32
    %57 = vector.broadcast %cst_33 : f32 to vector<8x128xf32>
    %58 = arith.maximumf %56, %57 : vector<8x128xf32>
    %c4_i32_34 = arith.constant 4 : i32
    %59 = tpu.dynamic_rotate %58 by %c4_i32_34 dim 1 : vector<8x128xf32>, i32 -> vector<8x128xf32>
    %60 = tpu.iota {dimensions = array<i32: 1>} : vector<8x128xi32>
    %c4_i32_35 = arith.constant 4 : i32
    %61 = vector.broadcast %c4_i32_35 : i32 to vector<8x128xi32>
    %62 = arith.cmpi slt, %60, %61 : vector<8x128xi32>
    %cst_36 = arith.constant 0.000000e+00 : f32
    %63 = vector.broadcast %cst_36 : f32 to vector<8x128xf32>
    %64 = arith.select %62, %63, %59 : vector<8x128xi1>, vector<8x128xf32>
    %c2_i32_37 = arith.constant 2 : i32
    %65 = tpu.dynamic_rotate %58 by %c2_i32_37 dim 1 : vector<8x128xf32>, i32 -> vector<8x128xf32>
    %66 = tpu.iota {dimensions = array<i32: 1>} : vector<8x128xi32>
    %c2_i32_38 = arith.constant 2 : i32
    %67 = vector.broadcast %c2_i32_38 : i32 to vector<8x128xi32>
    %68 = arith.cmpi slt, %66, %67 : vector<8x128xi32>
    %cst_39 = arith.constant 0.000000e+00 : f32
    %69 = vector.broadcast %cst_39 : f32 to vector<8x128xf32>
    %70 = arith.select %68, %69, %65 : vector<8x128xi1>, vector<8x128xf32>
    %71 = tpu.concatenate %64, %70, %58 in 0 : vector<8x128xf32>, vector<8x128xf32>, vector<8x128xf32> -> vector<24x128xf32>
    %cst_40 = arith.constant dense<0.000000e+00> : vector<8x128xf32>
    %72 = tpu.matmul %42, %71, %cst_40 {dimension_numbers = #tpu.dot_dimension_numbers<[1], [0], [0], [1], [0, 0, 1, 1], [], []>} : vector<8x24xf32>, vector<24x128xf32>, vector<8x128xf32> -> vector<8x128xf32>
    %cst_41 = arith.constant 0.000000e+00 : f32
    %73 = vector.broadcast %cst_41 : f32 to vector<8x128xf32>
    %74 = arith.maximumf %72, %73 : vector<8x128xf32>
    %75 = arith.addf %74, %40 : vector<8x128xf32>
    %cst_42 = arith.constant 0.000000e+00 : f32
    %76 = vector.broadcast %cst_42 : f32 to vector<8x128xf32>
    %77 = arith.maximumf %75, %76 : vector<8x128xf32>
    %c0_43 = arith.constant 0 : index
    %c0_44 = arith.constant 0 : index
    %78 = vector.load %arg7[%c0_43, %c0_44] : memref<16x8xf32, #tpu.memory_space<vmem>>, vector<16x8xf32>
    %cst_45 = arith.constant dense<0.000000e+00> : vector<16x128xf32>
    %79 = tpu.matmul %78, %77, %cst_45 {dimension_numbers = #tpu.dot_dimension_numbers<[1], [0], [0], [1], [0, 0, 1, 1], [], []>} : vector<16x8xf32>, vector<8x128xf32>, vector<16x128xf32> -> vector<16x128xf32>
    %80 = vector.extract_strided_slice %79 {offsets = [0, 31], sizes = [16, 1], strides = [1, 1]} : vector<16x128xf32> to vector<16x1xf32>
    %c0_46 = arith.constant 0 : index
    %c0_47 = arith.constant 0 : index
    %81 = vector.load %arg8[%c0_46, %c0_47] : memref<16x1xf32, #tpu.memory_space<vmem>>, vector<16x1xf32>
    %82 = arith.addf %80, %81 : vector<16x1xf32>
    %c0_48 = arith.constant 0 : index
    %c0_49 = arith.constant 0 : index
    %c0_50 = arith.constant 0 : index
    %83 = vector.load %arg9[%c0_48, %c0_49, %c0_50] : memref<1x16x1xf32, #tpu.memory_space<vmem>>, vector<1x16x1xf32>
    %84 = vector.shape_cast %83 : vector<1x16x1xf32> to vector<16x1xf32>
    %85 = vector.shape_cast %82 : vector<16x1xf32> to vector<1x16x1xf32>
    tpu.vector_store %arg9[%c0_48, %c0_49, %c0_50], %85 {strides = array<i32>} : memref<1x16x1xf32, #tpu.memory_space<vmem>>, vector<1x16x1xf32>,
    return
  }
  func.func @transform_0(%arg0: i32) -> (i32, i32, i32) {
    %c0_i32 = arith.constant 0 : i32
    %c0_i32_0 = arith.constant 0 : i32
    %c0_i32_1 = arith.constant 0 : i32
    return %arg0, %c0_i32, %c0_i32_0 : i32, i32, i32
  }
  func.func @transform_1(%arg0: i32) -> (i32, i32) {
    %c0_i32 = arith.constant 0 : i32
    %c0_i32_0 = arith.constant 0 : i32
    %c0_i32_1 = arith.constant 0 : i32
    return %c0_i32, %c0_i32_0 : i32, i32
  }
  func.func @transform_2(%arg0: i32) -> (i32, i32) {
    %c0_i32 = arith.constant 0 : i32
    %c0_i32_0 = arith.constant 0 : i32
    %c0_i32_1 = arith.constant 0 : i32
    return %c0_i32, %c0_i32_0 : i32, i32
  }
  func.func @transform_3(%arg0: i32) -> (i32, i32) {
    %c0_i32 = arith.constant 0 : i32
    %c0_i32_0 = arith.constant 0 : i32
    %c0_i32_1 = arith.constant 0 : i32
    return %c0_i32, %c0_i32_0 : i32, i32
  }
  func.func @transform_4(%arg0: i32) -> (i32, i32) {
    %c0_i32 = arith.constant 0 : i32
    %c0_i32_0 = arith.constant 0 : i32
    %c0_i32_1 = arith.constant 0 : i32
    return %c0_i32, %c0_i32_0 : i32, i32
  }
  func.func @transform_5(%arg0: i32) -> (i32, i32) {
    %c0_i32 = arith.constant 0 : i32
    %c0_i32_0 = arith.constant 0 : i32
    %c0_i32_1 = arith.constant 0 : i32
    return %c0_i32, %c0_i32_0 : i32, i32
  }
  func.func @transform_6(%arg0: i32) -> (i32, i32) {
    %c0_i32 = arith.constant 0 : i32
    %c0_i32_0 = arith.constant 0 : i32
    %c0_i32_1 = arith.constant 0 : i32
    return %c0_i32, %c0_i32_0 : i32, i32
  }
  func.func @transform_7(%arg0: i32) -> (i32, i32) {
    %c0_i32 = arith.constant 0 : i32
    %c0_i32_0 = arith.constant 0 : i32
    %c0_i32_1 = arith.constant 0 : i32
    return %c0_i32, %c0_i32_0 : i32, i32
  }
  func.func @transform_8(%arg0: i32) -> (i32, i32, i32) {
    %c0_i32 = arith.constant 0 : i32
    %c0_i32_0 = arith.constant 0 : i32
    %c0_i32_1 = arith.constant 0 : i32
    return %arg0, %c0_i32, %c0_i32_0 : i32, i32, i32
  }
}

</mosaic_0001>

<bundles_post_ra>
// kernel: tpu_custom_call.1
= control target key start
LH: loop header
LB: loop body
LE: loop exit
PB: predicated region body
PF: predicated region fallthrough
CT: control target
= control target key end

     0   :  { %13 = vsyncpa [#allocation3], 0  ;;  %s1142_s27 = smov 0   ;;  %s1270_s0 = inlined_call_operand.vmem [shape: f32[2,8,128], index: 0, kind: input, shape index: {}]   ;;  %s1271_s1 = inlined_call_operand.vmem [shape: f32[8,24], index: 1, kind: input, shape index: {}]   ;;  %s1272_s2 = inlined_call_operand.vmem [shape: f32[8,24], index: 2, kind: input, shape index: {}]   ;;  %s1273_s3 = inlined_call_operand.vmem [shape: f32[8,8], index: 3, kind: input, shape index: {}]   ;;  %s1274_s4 = inlined_call_operand.vmem [shape: f32[8,24], index: 4, kind: input, shape index: {}]   ;;  %s1275_s5 = inlined_call_operand.hbm [shape: f32[8,24], index: 5, kind: input, shape index: {}]   ;;  %s1276_s6 = inlined_call_operand.vmem [shape: f32[16,8], index: 6, kind: input, shape index: {}]   ;;  %s1277_s7 = inlined_call_operand.vmem [shape: f32[16,1], index: 7, kind: input, shape index: {}]   ;;  %s1278_s8 = inlined_call_operand.vmem [shape: f32[2,16,1], index: 8, kind: output, shape index: {}]  }
   0x1 LB: > { %s1148_s28 = sadd.s32 4294967295, %s1086_s27   ;;  %p901_p0 = scmp.ge.s32.totalorder %s1086_s27, 1  ;;  %s1086_s27 = sphi %s1142_s27, %s19_s27  }
   0x2   : > { %p223_p1 = scmp.lt.s32.totalorder %s1086_s27, 3  ;;  %p1279_p3 = scmp.eq.s32.totalorder %s1148_s28, 0 }
   0x3   : > { %s1088_s30 = smov [#allocation2]   ;;  %s1048_s13 = scalar_lea.hbm %s1275_s5, 128 }
   0x4   : > { %p1152_p2 = pnand %p901_p0, %p223_p1  ;;  %s248_s9 = sshll.u32 %s1088_s30, 4  ;;  %s249_s9 = int_to_ptr.vmem [resolvable:$true] %s248_s9 }
   0x5   : > { %p1049_p6 = scmp.ne.s32.totalorder %s1275_s5, %s1048_s13  ;;  %p1055_p10 = scmp.lt.u32.totalorder %s1048_s13, %s1275_s5 }
   0x6   : > { %s1281_s29 = scalar_select %p1152_p2, 1, 0 }
   0x7   : > { %p1025_p4 = pneg %p1152_p2 }
   0x9   : > { %p1161_p5 = pnand %p1279_p3, %p1025_p4 }
   0xb   : > { %p1050_p7 = pneg %p1161_p5 }
   0xd   : > { %p1051_p8 = pnand %p1050_p7, %p1049_p6 }
   0xf   : > { %p1052_p9 = pneg %p1051_p8 }
  0x11   : > { %p1057_p11 = pnand %p1055_p10, %p1052_p9 }
  0x13   : > { %1060 = shalt.err (!%p1057_p11)
}
  0x14   : > { %s1061_s18 = scalar_lea.vmem %s249_s9, 128  ;;  %p1069_p1 = scmp.lt.s32.totalorder %s249_s9, %s249_s9 }
  0x15   : > { %p1062_p12 = scmp.ne.s32.totalorder %s249_s9, %s1061_s18  ;;  %p1070_p4 = scmp.lt.s32.totalorder %s1061_s18, %s1061_s18 }
  0x17   : > { %p1064_p13 = pnand %p1062_p12, %p1050_p7  ;;  %p1071_p3 = por %p1070_p4, %p1069_p1 }
  0x19   : > { %p1065_p0 = pneg %p1064_p13 }
  0x1b   : > { %p1072_p2 = pnand %p1071_p3, %p1065_p0 }
  0x1d   : > { %1075 = shalt.err (!%p1072_p2)
}
  0x1e   : > { %1028 = dma.hbm_to_vmem [thread:$0]  (!%p1161_p5), %s1275_s5, 128, %s249_s9, [#allocation3]  }
  0x1f   : > { %p1283_p6 = scmp.ne.s32.totalorder %s1281_s29, 0 }
  0x20   : > { %p1284_p8 = scmp.eq.s32.totalorder (!%p1283_p6), %s1148_s28, 0 }
  0x21   : > { %274 = sbr.rel (%p1283_p6) target bundleno = 1740 (0x6cc), region = 52 }
  0x28   : > { %1081 = dma.done.wait (%p1284_p8), [#allocation3], 128   ;;  %p1285_p7 = pmov %p1284_p8 }
  0x29   : > { %p307_p9 = scmp.lt.s32.totalorder %s1148_s28, 1  ;;  %v396_v0 = vlaneseq  ;;  %v1089_v1 = vmov 0.0|0.0   ;;  %v1090_v3 = vmov 0.0   ;;  %vm1091_vm2 = vmmov 0   ;;  %s1092_s25 = smov 2   ;;  %v317_v10 = vld [vmem:[%s1271_s1] sm:$0xff] }
  0x2a   : > { %1083 = vsyncadd (%p1285_p7), [#allocation3], 4294967168  ;;  %1005 = vmatprep.subr.bf16.mxu1 %v1089_v1  ;;  %959 = vmatprep.subr.mxu0 %v1090_v3  ;;  %s1093_s26 = smov 1   ;;  %vm404_vm6 = vcmask 195584   ;;  %v319_v11 = vld [vmem:[%s1273_s3] sm:$0xff]  ;;  %vm320_vm7 = vcmask 64512  }
  0x2b   : > { %s1291_s28 = smov (!%p307_p9, %s1148_s28), 1  ;;  %v397_v2 = vand.u32 127, %v396_v0  ;;  %970 = vmatprep.mubr.msk.f32.mxu1 %vm1091_vm2, %v1090_v3  ;;  %961 = vmatprep.mubr.msk.f32.mxu0 %vm1091_vm2, %v1090_v3  ;;  %v318_v18 = vld [vmem:[%s1272_s2] sm:$0xff]  ;;  %s1094_s13 = smov 4   ;;  %v810_v38 = vld [vmem:[%s1277_s7 + $0x8] sm:$0xff]  ;;  %vm829_vm8 = vcmask 7168  }
  0x2c   : > { %s906_s21 = sshll.u32 %s1291_s28, 3  ;;  %v561_v29 = vld [vmem:[%s1274_s4] sm:$0xff]  ;;  %s1095_s22 = smov 31   ;;  %v727_v45 = vld [vmem:[%s1276_s6 + $0x8] sm:$0xff] }
  0x2d   : > { %vm937_vm0 = vcmp.ge.s32.totalorder %v397_v2, 4  ;;  %s310_s24 = scalar_lea.vmem %s1270_s0, %s906_s21  ;;  %vm935_vm1 = vcmp.ge.s32.totalorder %v397_v2, 2  ;;  %vm936_vm4 = vcmp.ge.s32.totalorder %v397_v2, 1  ;;  %v562_v36 = vld [vmem:[#allocation2] sm:$0xff] }
  0x2e   : > { %vm1201_vm3 = vmpackc.low %vm935_vm1, %vm937_vm0  ;;  %v316_v5 = vld [vmem:[%s310_s24] sm:$0xff] }
  0x2f   : > { %394 = vrot.lane.b32.xlu0 %v316_v5, %s1092_s25  ;;  %960 = vmatpush3.msra.mxu0 %v316_v5  ;;  %vm1207_vm5 = vmpackc.low %vm936_vm4, %vm935_vm1  ;;  %v726_v37 = vld [vmem:[%s1276_s6] sm:$0xff] }
  0x30   : > { %1009 = vmatprep.subr.bf16.mxu0 %v1089_v1  ;;  %962 = vmatmul.mubr.msk.f32.vlgmr.msra.gmra.mrb[0].mxu0 %vm320_vm7, %v319_v11  ;;  %v809_v39 = vld [vmem:[%s1277_s7] sm:$0xff] }
  0x31   : > { %979 = vmatprep.mubr.msk.f32.mxu0 %vm1091_vm2, %v1090_v3 }
  0x33   : > { %400 = vrot.lane.b32.xlu0 %v316_v5, %s1093_s26 }
  0xa1   : > { %v395_v6 = vpop.permute.xlu0 %394 }
  0xa5   : > { %v401_v7 = vpop.permute.xlu0 %400 }
  0xa6   : > { %v1006_v9 = vpack.c.bf16 %v401_v7, %v395_v6 }
  0xa8   : > { %1008 = vmatpush3.bf16.msk.msra.mxu1 %vm1207_vm5, %v1006_v9 }
  0xa9   : > { %968 = vmatprep.subr.mxu1 %v1090_v3 }
  0xac   : > { %969 = vmatpush3.msra.mxu1 %v316_v5 }
  0xad   : > { %971 = vmatmul.mubr.msk.f32.vlgmr.msra.gmra.mrb[0].mxu1 %vm404_vm6, %v317_v10  ;;  %1013 = vmatprep.subr.bf16.mxu1 %v1089_v1 }
  0xae   : > { %988 = vmatprep.mubr.msk.f32.mxu1 %vm1091_vm2, %v1090_v3 }
 0x103   : > { %v390_v19 = vpop.f32.mrb[0].mxu0 }
 0x104   : > { %v963_v20 = vpop.f32.mrb[1].mxu0 }
 0x180   : > { %v474_v12 = vpop.f32.mrb[0].mxu1 }
 0x181   : > { %v478_v13 = vmax.f32 %v474_v12, 0.0  ;;  %v972_v14 = vpop.f32.mrb[1].mxu1 }
 0x183   : > { %479 = vrot.lane.b32.xlu1 %v478_v13, %s1092_s25 }
 0x187   : > { %482 = vrot.lane.b32.xlu1 %v478_v13, %s1093_s26  ;;  %s934_s26 = sshll.u32 %s1291_s28, 4 }
 0x188   : > { %s315_s9 = scalar_lea.vmem %s1278_s8, %s934_s26 }
 0x1f5   : > { %v480_v15 = vpop.permute.xlu1 %479 }
 0x1f9   : > { %v483_v16 = vpop.permute.xlu1 %482 }
 0x1fa   : > { %v1010_v17 = vpack.c.bf16 %v483_v16, %v480_v15 }
 0x1fc   : > { %1012 = vmatpush3.bf16.msk.msra.mxu0 %vm1207_vm5, %v1010_v17 }
 0x1fd   : > { %977 = vmatprep.subr.mxu0 %v1090_v3 }
 0x200   : > { %978 = vmatpush3.msra.mxu0 %v478_v13 }
 0x201   : > { %980 = vmatmul.mubr.msk.f32.vlgmr.msra.gmra.mrb[2].mxu0 %vm404_vm6, %v318_v18  ;;  %1017 = vmatprep.subr.bf16.mxu0 %v1089_v1 }
 0x202   : > { %997 = vmatprep.mubr.msk.f32.mxu0 %vm1091_vm2, %v1090_v3 }
 0x2d4   : > { %v554_v21 = vpop.f32.mrb[2].mxu0 }
 0x2d5   : > { %v558_v22 = vmax.f32 %v554_v21, 0.0  ;;  %v981_v23 = vpop.f32.mrb[3].mxu0 }
 0x2d7   : > { %v559_v24 = vadd.f32 %v558_v22, %v390_v19 }
 0x2d9   : > { %v560_v25 = vmax.f32 %v559_v24, 0.0 }
 0x2db   : > { %567 = vrot.lane.b32.xlu1 %v560_v25, %s1092_s25  ;;  %563 = vrot.lane.b32.xlu0 %v560_v25, %s1094_s13 }
 0x34d   : > { %v568_v26 = vpop.permute.xlu1 %567  ;;  %v564_v27 = vpop.permute.xlu0 %563 }
 0x34e   : > { %v1014_v28 = vpack.c.bf16 %v568_v26, %v564_v27 }
 0x350   : > { %1016 = vmatpush3.bf16.msk.msra.mxu1 %vm1201_vm3, %v1014_v28 }
 0x351   : > { %986 = vmatprep.subr.mxu1 %v1090_v3 }
 0x354   : > { %987 = vmatpush3.msra.mxu1 %v560_v25 }
 0x355   : > { %989 = vmatmul.mubr.msk.f32.vlgmr.msra.gmra.mrb[2].mxu1 %vm404_vm6, %v561_v29 }
 0x356   : > { %1002 = vmatprep.mubr.msk.f32.mxu1 %vm320_vm7, %v726_v37 }
 0x428   : > { %v639_v30 = vpop.f32.mrb[2].mxu1 }
 0x429   : > { %v643_v31 = vmax.f32 %v639_v30, 0.0  ;;  %v990_v32 = vpop.f32.mrb[3].mxu1 }
 0x42b   : > { %647 = vrot.lane.b32.xlu1 %v643_v31, %s1092_s25  ;;  %644 = vrot.lane.b32.xlu0 %v643_v31, %s1094_s13  ;;  %s1096_s25 = smov 97  }
 0x42f   : > { %815 = vrot.lane.b32.xlu1 %v810_v38, %s1095_s22  ;;  %813 = vrot.lane.b32.xlu0 %v809_v39, %s1095_s22 }
 0x49d   : > { %v648_v33 = vpop.permute.xlu1 %647  ;;  %v645_v34 = vpop.permute.xlu0 %644 }
 0x49e   : > { %v1018_v35 = vpack.c.bf16 %v648_v33, %v645_v34 }
 0x4a0   : > { %1020 = vmatpush3.bf16.msk.msra.mxu0 %vm1201_vm3, %v1018_v35 }
 0x4a1   : > { %995 = vmatprep.subr.mxu0 %v1090_v3  ;;  %v816_v46 = vpop.permute.xlu1 %815  ;;  %v814_v47 = vpop.permute.xlu0 %813 }
 0x4a4   : > { %996 = vmatpush3.msra.mxu0 %v643_v31 }
 0x4a5   : > { %998 = vmatmul.mubr.msk.f32.vlgmr.msra.gmra.mrb[4].mxu0 %vm404_vm6, %v562_v36 }
 0x578   : > { %v719_v40 = vpop.f32.mrb[4].mxu0 }
 0x579   : > { %v723_v41 = vmax.f32 %v719_v40, 0.0  ;;  %v999_v42 = vpop.f32.mrb[5].mxu0 }
 0x57b   : > { %v724_v43 = vadd.f32 %v723_v41, %v560_v25 }
 0x57d   : > { %v725_v44 = vmax.f32 %v724_v43, 0.0 }
 0x57f   : > { %1000 = vmatprep.subr.mxu1 %v725_v44 }
 0x580   : > { %1001 = vmatpush3.msra.mxu1 %v725_v44 }
 0x581   : > { %1003 = vmatmul.mubr.msk.f32.vlgmr.msra.gmra.mrb[4].mxu1 %vm320_vm7, %v727_v45 }
 0x654   : > { %v1004_v48 = vpop.f32.mrb[4].mxu1 }
 0x655   : > { %v820_v49 = vadd.f32 %v1004_v48, %v816_v46  ;;  %v800_v50 = vpop.f32.mrb[5].mxu1 }
 0x656   : > { %v819_v51 = vadd.f32 %v814_v47, %v800_v50 }
 0x657   : > { %825 = vrot.lane.b32.xlu1 %v820_v49, %s1096_s25 }
 0x658   : > { %823 = vrot.lane.b32.xlu0 %v819_v51, %s1096_s25 }
 0x6c9   : > { %v826_v52 = vpop.permute.xlu1 %825 }
 0x6ca   : > { %831 = vst.msk [vmem:[%s315_s9 + $0x8] sm:$0xff] %vm829_vm8, %v826_v52  ;;  %v824_v53 = vpop.permute.xlu0 %823 }
 0x6cb   : > { %830 = vst.msk [vmem:[%s315_s9] sm:$0xff] %vm829_vm8, %v824_v53 }
 0x6cc PF: > { %s19_s27 = sadd.s32 1, %s1086_s27  }
 0x6cd   : > { %p16_p2 = scmp.ge.s32.totalorder %s19_s27, 4  }
 0x6cf   :  { %18 = sbr.rel (!%p16_p2) target bundleno = 1 (0x1), region = 87 }
 0x6d6   :  { %853 = vsyncpa [#allocation3], 1 }
 0x6d7   :  { %855 = vsyncpa [#allocation3 + $0x1], 1 }

</bundles_post_ra>
